<compile_context>
chip_gen: v7x
topology: tpu7x:2x2x1
jax: 0.10.0
libtpu: 0.0.40
codegen_flags: <defaults>
</compile_context>

<pallas_src>
import functools

import jax
import jax.numpy as jnp
from jax import lax
from jax.experimental import pallas as pl
from jax.experimental.pallas import tpu as pltpu

SCALE = 0.1        # non-learnable scalar (default config)
TEMP = 1.0
LN_EPS = 1e-6
NORM_EPS = 1e-12   # F.normalize eps (applied to the L2 norm)


def _pick_tq(n: int) -> int:
    """Query-tile size: full N if the (N, N) sim tile is small, else the
    largest divisor of N from a sublane-friendly list whose (TQ, N) f32
    intermediate stays under ~8 MiB."""
    budget_elems = (8 * 1024 * 1024) // 4
    if n * n <= budget_elems:
        return n
    for t in (512, 256, 128, 64, 32, 16, 8):
        if n % t == 0 and t * n <= budget_elems:
            return t
    # TODO(synk): pad/mask the sequence axis for N that has no clean tile.
    return n


def _contranorm_kernel(x_ref, g_ref, b_ref, o_ref, *, tq, d_real):
    # x_ref: (N, Dp)  full sequence (keys/values) for this batch element.
    # o_ref: (TQ, Dp) output tile for query rows [q*TQ, (q+1)*TQ).
    x_all = x_ref[...].astype(jnp.float32)                        # (N, Dp)

    # --- F.normalize(x, dim=-1) for the keys.  Padded feature columns are
    # exactly zero, so the norm over Dp equals the norm over the real D.
    # 1 / max(||x||, eps) == rsqrt(max(||x||^2, eps^2))  (EUP, no divide).
    ssq_k = jnp.sum(x_all * x_all, axis=-1, keepdims=True)
    k_b = (x_all * lax.rsqrt(jnp.maximum(ssq_k, NORM_EPS * NORM_EPS))
           ).astype(jnp.bfloat16)                                 # (N, Dp)

    # --- query tile: raw rows (needed for the residual) + their normalization.
    start = pl.multiple_of(pl.program_id(1) * tq, tq)
    x_q = x_ref[pl.ds(start, tq), :].astype(jnp.float32)          # (TQ, Dp)
    ssq_q = jnp.sum(x_q * x_q, axis=-1, keepdims=True)
    q_b = (x_q * lax.rsqrt(jnp.maximum(ssq_q, NORM_EPS * NORM_EPS))
           ).astype(jnp.bfloat16)                                 # (TQ, Dp)

    # --- sim tile = q_n @ k_n^T: contract the feature axis of both operands
    # directly on the MXU (no explicit transpose), accumulate in f32.
    sim = lax.dot_general(q_b, k_b, (((1,), (1,)), ((), ())),
                          preferred_element_type=jnp.float32)     # (TQ, N)
    if TEMP != 1.0:                      # trace-time: elided for temp == 1
        sim = sim * (1.0 / TEMP)
    if 1.0 / TEMP > 20.0:                # trace-time: unit-norm rows bound
        sim = sim - jnp.max(sim, axis=-1, keepdims=True)          # |sim|<=1/temp
    e = jnp.exp(sim)
    p = e * pl.reciprocal(jnp.sum(e, axis=-1, keepdims=True), approx=True)

    # --- x_neg = p @ x ; y = x - scale * x_neg   (padded columns stay 0).
    x_neg = jnp.dot(p.astype(jnp.bfloat16), x_all.astype(jnp.bfloat16),
                    preferred_element_type=jnp.float32)           # (TQ, Dp)
    y = x_q - SCALE * x_neg

    # --- LayerNorm over the *real* feature width d_real (eps = 1e-6).
    # Padded columns of y are exactly zero, so sums over Dp == sums over D;
    # use E[y^2] - mean^2 so zero columns never pollute the variance.
    inv_d = 1.0 / d_real
    mean = jnp.sum(y, axis=-1, keepdims=True) * inv_d
    var = jnp.maximum(
        jnp.sum(y * y, axis=-1, keepdims=True) * inv_d - mean * mean, 0.0)
    yhat = (y - mean) * lax.rsqrt(var + LN_EPS)
    o_ref[...] = (yhat * g_ref[...] + b_ref[...]).astype(o_ref.dtype)


def contranorm(x, gamma, beta):
    """x: (B, N, D) float32; gamma, beta: (D,) LayerNorm affine params."""
    B, N, D = x.shape
    Dp = ((D + 127) // 128) * 128          # lane-dense feature width
    if Dp != D:
        x_p = jnp.pad(x, ((0, 0), (0, 0), (0, Dp - D)))
        gamma_p = jnp.pad(gamma, (0, Dp - D), constant_values=1.0)
        beta_p = jnp.pad(beta, (0, Dp - D))
    else:
        x_p, gamma_p, beta_p = x, gamma, beta

    tq = _pick_tq(N)
    grid = (B, N // tq)
    kernel = functools.partial(_contranorm_kernel, tq=tq, d_real=D)

    out = pl.pallas_call(
        kernel,
        out_shape=jax.ShapeDtypeStruct((B, N, Dp), x.dtype),
        grid_spec=pltpu.PrefetchScalarGridSpec(
            num_scalar_prefetch=0,
            grid=grid,
            in_specs=[
                # Full key/value block; q-invariant index -> DMA'd once per b.
                pl.BlockSpec((pl.Squeezed(), N, Dp), lambda b, q: (b, 0, 0)),
                pl.BlockSpec((1, Dp), lambda b, q: (0, 0)),
                pl.BlockSpec((1, Dp), lambda b, q: (0, 0)),
            ],
            out_specs=pl.BlockSpec((pl.Squeezed(), tq, Dp),
                                   lambda b, q: (b, q, 0)),
        ),
        compiler_params=pltpu.CompilerParams(
            # No cross-step accumulators -> both grid axes are independent and
            # can be megacore-sharded (matters on v7x's 2 TCs / chip).
            dimension_semantics=("parallel", "parallel"),
            # Raise the scoped-VMEM cap above the 16/32 MiB defaults but keep
            # headroom under v7x's 64 MiB physical VMEM.
            vmem_limit_bytes=48 * 1024 * 1024,
        ),
    )(x_p, gamma_p.reshape(1, Dp), beta_p.reshape(1, Dp))

    return out[..., :D] if Dp != D else out


def contranorm_ref(x, gamma, beta):
    """Pure-JAX f32 reference mirroring the PyTorch forward (default flags)."""
    nrm = jnp.sqrt(jnp.sum(x * x, axis=-1, keepdims=True))
    xn = x / jnp.maximum(nrm, NORM_EPS)
    sim = jnp.einsum("bnd,bmd->bnm", xn, xn) / TEMP
    p = jax.nn.softmax(sim, axis=-1)
    x_neg = jnp.einsum("bnm,bmd->bnd", p, x)
    y = x - SCALE * x_neg
    mean = jnp.mean(y, axis=-1, keepdims=True)
    var = jnp.mean((y - mean) ** 2, axis=-1, keepdims=True)
    yhat = (y - mean) * lax.rsqrt(var + LN_EPS)
    return yhat * gamma.reshape(1, 1, -1) + beta.reshape(1, 1, -1)


if __name__ == "__main__":
    B, N, D = 2, 8, 32
    key = jax.random.PRNGKey(0)
    x = jax.random.normal(key, (B, N, D), dtype=jnp.float32)

    # PyTorch LayerNorm default init: weight = 1, bias = 0.
    gamma = jnp.ones((D,), dtype=jnp.float32)
    beta = jnp.zeros((D,), dtype=jnp.float32)

    out = contranorm(x, gamma, beta)
    out = jax.block_until_ready(out)

    ref = contranorm_ref(x, gamma, beta)
    assert out.shape == (B, N, D)
    # bf16 MXU operands + approx EUP reciprocal perturb results slightly vs.
    # the pure-f32 reference; 5e-3 comfortably bounds that while still
    # catching any semantic bug (wrong axis / scale / eps would be >> 5e-3).
    max_err = jnp.max(jnp.abs(out - ref))
    assert jnp.allclose(out, ref, atol=5e-3, rtol=5e-3), f"mismatch: {max_err}"

    print("KERNEL_OK")
</pallas_src>

<mosaic_0001>
module attributes {stable_mosaic.version = 11 : i64} {
  func.func @_contranorm_kernel(%arg0: i32, %arg1: i32, %arg2: memref<1x8x128xf32, #tpu.memory_space<vmem>>, %arg3: memref<1x128xf32, #tpu.memory_space<vmem>>, %arg4: memref<1x128xf32, #tpu.memory_space<vmem>>, %arg5: memref<1x8x128xf32, #tpu.memory_space<vmem>>) attributes {dimension_semantics = [#tpu.dimension_semantics<parallel>, #tpu.dimension_semantics<parallel>], iteration_bounds = array<i64: 2, 1>, scalar_prefetch = 0 : i64, scratch_operands = 0 : i64, tpu.core_type = #tpu.core_type<tc>, window_params = [{transform_indices = @transform_0, window_bounds = array<i64: 1, 8, 128>}, {pipeline_mode = #tpu.pipeline_mode<synchronous>, transform_indices = @transform_1, window_bounds = array<i64: 1, 128>}, {pipeline_mode = #tpu.pipeline_mode<synchronous>, transform_indices = @transform_2, window_bounds = array<i64: 1, 128>}, {transform_indices = @transform_3, window_bounds = array<i64: 1, 8, 128>}]} {
    %c0 = arith.constant 0 : index
    %c0_0 = arith.constant 0 : index
    %c0_1 = arith.constant 0 : index
    %0 = vector.load %arg2[%c0, %c0_0, %c0_1] : memref<1x8x128xf32, #tpu.memory_space<vmem>>, vector<1x8x128xf32>
    %1 = vector.shape_cast %0 : vector<1x8x128xf32> to vector<8x128xf32>
    %2 = arith.mulf %1, %1 : vector<8x128xf32>
    %cst = arith.constant dense<0.000000e+00> : vector<8xf32>
    %3 = vector.multi_reduction <add>, %2, %cst [1] : vector<8x128xf32> to vector<8xf32>
    %4 = vector.shape_cast %3 : vector<8xf32> to vector<8x1xf32>
    %cst_2 = arith.constant 1.000000e-24 : f32
    %5 = vector.broadcast %cst_2 : f32 to vector<8x1xf32>
    %6 = arith.maximumf %4, %5 : vector<8x1xf32>
    %7 = math.rsqrt %6 : vector<8x1xf32>
    %8 = vector.broadcast %7 : vector<8x1xf32> to vector<8x128xf32>
    %9 = arith.mulf %1, %8 : vector<8x128xf32>
    %10 = arith.truncf %9 : vector<8x128xf32> to vector<8x128xbf16>
    %c8_i32 = arith.constant 8 : i32
    %11 = arith.muli %arg1, %c8_i32 : i32
    %12 = tpu.assume_multiple %11, 8 : i32
    %c0_3 = arith.constant 0 : index
    %13 = arith.index_cast %12 : i32 to index
    %c0_4 = arith.constant 0 : index
    %14 = vector.load %arg2[%c0_3, %13, %c0_4] : memref<1x8x128xf32, #tpu.memory_space<vmem>>, vector<1x8x128xf32>
    %15 = vector.shape_cast %14 : vector<1x8x128xf32> to vector<8x128xf32>
    %16 = arith.mulf %15, %15 : vector<8x128xf32>
    %cst_5 = arith.constant dense<0.000000e+00> : vector<8xf32>
    %17 = vector.multi_reduction <add>, %16, %cst_5 [1] : vector<8x128xf32> to vector<8xf32>
    %18 = vector.shape_cast %17 : vector<8xf32> to vector<8x1xf32>
    %cst_6 = arith.constant 1.000000e-24 : f32
    %19 = vector.broadcast %cst_6 : f32 to vector<8x1xf32>
    %20 = arith.maximumf %18, %19 : vector<8x1xf32>
    %21 = math.rsqrt %20 : vector<8x1xf32>
    %22 = vector.broadcast %21 : vector<8x1xf32> to vector<8x128xf32>
    %23 = arith.mulf %15, %22 : vector<8x128xf32>
    %24 = arith.truncf %23 : vector<8x128xf32> to vector<8x128xbf16>
    %cst_7 = arith.constant dense<0.000000e+00> : vector<8x8xf32>
    %25 = tpu.matmul %24, %10, %cst_7 {dimension_numbers = #tpu.dot_dimension_numbers<[1], [1], [0], [0], [0, 0, 1, 0], [], []>} : vector<8x128xbf16>, vector<8x128xbf16>, vector<8x8xf32> -> vector<8x8xf32>
    %26 = math.exp %25 : vector<8x8xf32>
    %cst_8 = arith.constant dense<0.000000e+00> : vector<8xf32>
    %27 = vector.multi_reduction <add>, %26, %cst_8 [1] : vector<8x8xf32> to vector<8xf32>
    %28 = vector.shape_cast %27 : vector<8xf32> to vector<8x1xf32>
    %29 = tpu.reciprocal %28 {approx = true} : vector<8x1xf32> -> vector<8x1xf32>
    %30 = vector.broadcast %29 : vector<8x1xf32> to vector<8x8xf32>
    %31 = arith.mulf %26, %30 : vector<8x8xf32>
    %32 = arith.truncf %31 : vector<8x8xf32> to vector<8x8xbf16>
    %33 = arith.truncf %1 : vector<8x128xf32> to vector<8x128xbf16>
    %cst_9 = arith.constant dense<0.000000e+00> : vector<8x128xf32>
    %34 = tpu.matmul %32, %33, %cst_9 {dimension_numbers = #tpu.dot_dimension_numbers<[1], [0], [0], [1], [0, 0, 1, 1], [], []>} : vector<8x8xbf16>, vector<8x128xbf16>, vector<8x128xf32> -> vector<8x128xf32>
    %cst_10 = arith.constant 1.000000e-01 : f32
    %35 = vector.broadcast %cst_10 : f32 to vector<8x128xf32>
    %36 = arith.mulf %35, %34 : vector<8x128xf32>
    %37 = arith.subf %15, %36 : vector<8x128xf32>
    %cst_11 = arith.constant dense<0.000000e+00> : vector<8xf32>
    %38 = vector.multi_reduction <add>, %37, %cst_11 [1] : vector<8x128xf32> to vector<8xf32>
    %39 = vector.shape_cast %38 : vector<8xf32> to vector<8x1xf32>
    %cst_12 = arith.constant 3.125000e-02 : f32
    %40 = vector.broadcast %cst_12 : f32 to vector<8x1xf32>
    %41 = arith.mulf %39, %40 : vector<8x1xf32>
    %42 = arith.mulf %37, %37 : vector<8x128xf32>
    %cst_13 = arith.constant dense<0.000000e+00> : vector<8xf32>
    %43 = vector.multi_reduction <add>, %42, %cst_13 [1] : vector<8x128xf32> to vector<8xf32>
    %44 = vector.shape_cast %43 : vector<8xf32> to vector<8x1xf32>
    %cst_14 = arith.constant 3.125000e-02 : f32
    %45 = vector.broadcast %cst_14 : f32 to vector<8x1xf32>
    %46 = arith.mulf %44, %45 : vector<8x1xf32>
    %47 = arith.mulf %41, %41 : vector<8x1xf32>
    %48 = arith.subf %46, %47 : vector<8x1xf32>
    %cst_15 = arith.constant 0.000000e+00 : f32
    %49 = vector.broadcast %cst_15 : f32 to vector<8x1xf32>
    %50 = arith.maximumf %48, %49 : vector<8x1xf32>
    %51 = vector.broadcast %41 : vector<8x1xf32> to vector<8x128xf32>
    %52 = arith.subf %37, %51 : vector<8x128xf32>
    %cst_16 = arith.constant 9.99999997E-7 : f32
    %53 = vector.broadcast %cst_16 : f32 to vector<8x1xf32>
    %54 = arith.addf %50, %53 : vector<8x1xf32>
    %55 = math.rsqrt %54 : vector<8x1xf32>
    %56 = vector.broadcast %55 : vector<8x1xf32> to vector<8x128xf32>
    %57 = arith.mulf %52, %56 : vector<8x128xf32>
    %c0_17 = arith.constant 0 : index
    %c0_18 = arith.constant 0 : index
    %58 = vector.load %arg3[%c0_17, %c0_18] : memref<1x128xf32, #tpu.memory_space<vmem>>, vector<1x128xf32>
    %59 = vector.broadcast %58 : vector<1x128xf32> to vector<8x128xf32>
    %60 = arith.mulf %57, %59 : vector<8x128xf32>
    %c0_19 = arith.constant 0 : index
    %c0_20 = arith.constant 0 : index
    %61 = vector.load %arg4[%c0_19, %c0_20] : memref<1x128xf32, #tpu.memory_space<vmem>>, vector<1x128xf32>
    %62 = vector.broadcast %61 : vector<1x128xf32> to vector<8x128xf32>
    %63 = arith.addf %60, %62 : vector<8x128xf32>
    %c0_21 = arith.constant 0 : index
    %c0_22 = arith.constant 0 : index
    %c0_23 = arith.constant 0 : index
    %64 = vector.load %arg5[%c0_21, %c0_22, %c0_23] : memref<1x8x128xf32, #tpu.memory_space<vmem>>, vector<1x8x128xf32>
    %65 = vector.shape_cast %64 : vector<1x8x128xf32> to vector<8x128xf32>
    %66 = vector.shape_cast %63 : vector<8x128xf32> to vector<1x8x128xf32>
    tpu.vector_store %arg5[%c0_21, %c0_22, %c0_23], %66 {strides = array<i32>} : memref<1x8x128xf32, #tpu.memory_space<vmem>>, vector<1x8x128xf32>,
    return
  }
  func.func @transform_0(%arg0: i32, %arg1: i32) -> (i32, i32, i32) {
    %c0_i32 = arith.constant 0 : i32
    %c0_i32_0 = arith.constant 0 : i32
    %c0_i32_1 = arith.constant 0 : i32
    return %arg0, %c0_i32, %c0_i32_0 : i32, i32, i32
  }
  func.func @transform_1(%arg0: i32, %arg1: i32) -> (i32, i32) {
    %c0_i32 = arith.constant 0 : i32
    %c0_i32_0 = arith.constant 0 : i32
    %c0_i32_1 = arith.constant 0 : i32
    return %c0_i32, %c0_i32_0 : i32, i32
  }
  func.func @transform_2(%arg0: i32, %arg1: i32) -> (i32, i32) {
    %c0_i32 = arith.constant 0 : i32
    %c0_i32_0 = arith.constant 0 : i32
    %c0_i32_1 = arith.constant 0 : i32
    return %c0_i32, %c0_i32_0 : i32, i32
  }
  func.func @transform_3(%arg0: i32, %arg1: i32) -> (i32, i32, i32) {
    %c0_i32 = arith.constant 0 : i32
    %c0_i32_0 = arith.constant 0 : i32
    return %arg0, %arg1, %c0_i32 : i32, i32, i32
  }
}

</mosaic_0001>

<bundles_post_ra>
// kernel: tpu_custom_call.1
= control target key start
LH: loop header
LB: loop body
LE: loop exit
PB: predicated region body
PF: predicated region fallthrough
CT: control target
= control target key end

     0   :  { %8 = vsyncpa [#allocation3], 0  ;;  %s871_s0 = inlined_call_operand.hbm [shape: f32[2,8,128], index: 0, kind: input, shape index: {}]   ;;  %s872_s1 = inlined_call_operand.vmem [shape: f32[1,128], index: 1, kind: input, shape index: {}]   ;;  %s873_s2 = inlined_call_operand.vmem [shape: f32[1,128], index: 2, kind: input, shape index: {}]   ;;  %s874_s3 = inlined_call_operand.hbm [shape: f32[2,8,128], index: 3, kind: output, shape index: {}]  }
   0x1   :  { %10 = vsyncpa [#allocation3 + $0x1], 0 }
   0x2   :  { %11 = vsyncpa [#allocation4], 0 }
   0x3   :  { %13 = vsyncpa [#allocation4 + $0x1], 0  ;;  %s689_s12 = smov 0   ;;  %s691_s13 = smov 0  }
   0x4   :  { %s693_s14 = smov 0   ;;  %s695_s15 = smov 0  }
   0x5   :  { %s697_s16 = smov 0   ;;  %s699_s17 = smov 0  }
   0x6 LB: > { %s445_s18 = sadd.s32 4294967295, %s663_s17   ;;  %s446_s19 = sadd.s32 4294967294, %s663_s17   ;;  %s663_s17 = sphi %s699_s17, %s19_s17   ;;  %s659_s16 = sphi %s697_s16, %s890_s16   ;;  %s655_s15 = sphi %s695_s15, %s889_s15   ;;  %s651_s14 = sphi %s693_s14, %s888_s14   ;;  %s647_s13 = sphi %s691_s13, %s887_s13   ;;  %s643_s12 = sphi %s689_s12, %s886_s12  }
   0x7   : > { %s31_s20 = sadd.s32 1, %s659_s16  ;;  %s38_s21 = sadd.s32 1, %s651_s14 }
   0x8   : > { %p33_p0 = scmp.ge.s32.totalorder %s31_s20, 2  ;;  %p45_p1 = scmp.ne.s32.totalorder %s651_s14, %s647_s13 }
   0x9   : > { %p46_p2 = scmp.eq.s32.totalorder %s663_s17, 0  ;;  %p51_p3 = scmp.ne.s32.totalorder %s647_s13, %s643_s12 }
   0xa   : > { %s892_s20 = smov (%p33_p0, %s31_s20), 0  ;;  %p52_p5 = scmp.eq.s32.totalorder %s445_s18, 0 }
   0xb   : > { %p730_p4 = por %p46_p2, %p45_p1  ;;  %s35_s23 = ssub.s32 %s659_s16, %s892_s20 }
   0xc   : > { %p119_p6 = scmp.eq.s32.totalorder %s445_s18, 1  ;;  %p36_p7 = scmp.eq.s32.totalorder %s35_s23, 0 }
   0xd   : > { %p736_p8 = por %p52_p5, %p51_p3  ;;  %p125_p10 = scmp.eq.s32.totalorder %s446_s19, 1 }
   0xe   : > { %p740_p9 = por %p119_p6, %p45_p1  ;;  %p489_p13 = scmp.lt.s32.totalorder %s663_s17, 2 }
   0xf   : > { %s745_s26 = scalar_select %p36_p7, %s651_s14, %s38_s21  }
  0x10   : > { %s878_s25 = scalar_select %p740_p9, 1, 0 }
  0x11   : > { %p747_p11 = por %p125_p10, %p51_p3  ;;  %s151_s28 = sand.u32 1, %s651_s14  }
  0x12   : > { %s449_s29 = sshll.u32 %s151_s28, 3  ;;  %s450_s30 = sshll.u32 %s659_s16, 7 }
  0x13   : > { %s879_s27 = scalar_select %p747_p11, 1, 0 }
  0x14   : > { %s758_s6 = scalar_lea.hbm %s871_s0, %s450_s30  ;;  %s155_s7 = scalar_lea.vmem [#allocation2], %s449_s29 }
  0x15   : > { %s162_s8 = sshll.u32 %s155_s7, 4  ;;  %p764_p0 = pnand %p489_p13, %p730_p4  ;;  %s760_s8 = int_to_ptr.vmem [resolvable:$true] %s162_s8 }
  0x16   : > { %s152_s10 = scalar_lea.sflag [#allocation3], %s151_s28  ;;  %s551_s11 = scalar_lea.hbm %s758_s6, 128 }
  0x17   : > { %p552_p3 = scmp.ne.s32.totalorder %s758_s6, %s551_s11  ;;  %p553_p5 = pneg %p764_p0 }
  0x18   : > { %s556_s21 = scalar_lea.hbm %s871_s0, 256  ;;  %p557_p4 = scmp.lt.u32.totalorder %s758_s6, %s871_s0 }
  0x19   : > { %p554_p6 = pnand %p553_p5, %p552_p3  ;;  %p558_p10 = scmp.lt.u32.totalorder %s556_s21, %s551_s11 }
  0x1a   : > { %p560_p12 = scmp.lt.u32.totalorder %s551_s11, %s758_s6 }
  0x1b   : > { %p555_p7 = pneg %p554_p6  ;;  %p559_p13 = por %p558_p10, %p557_p4 }
  0x1d   : > { %p561_p1 = por %p560_p12, %p559_p13 }
  0x1f   : > { %p562_p2 = pnand %p561_p1, %p555_p7 }
  0x21   : > { %565 = shalt.err (!%p562_p2)
}
  0x22   : > { %s566_s28 = scalar_lea.vmem %s760_s8, 128  ;;  %s665_s29 = smov [#allocation2]  }
  0x23   : > { %p567_p3 = scmp.ne.s32.totalorder %s760_s8, %s566_s28  ;;  %s571_s30 = sshll.u32 %s665_s29, 4  ;;  %s572_s30 = int_to_ptr.vmem [resolvable:$false] %s571_s30 }
  0x24   : > { %s573_s4 = scalar_lea.vmem %s572_s30, 256  ;;  %p574_p9 = scmp.lt.s32.totalorder %s760_s8, %s572_s30 }
  0x25   : > { %p569_p6 = pnand %p567_p3, %p553_p5  ;;  %p575_p4 = scmp.lt.s32.totalorder %s573_s4, %s566_s28 }
  0x27   : > { %p570_p11 = pneg %p569_p6  ;;  %p576_p10 = por %p575_p4, %p574_p9 }
  0x29   : > { %p577_p12 = pnand %p576_p10, %p570_p11 }
  0x2b   : > { %580 = shalt.err (!%p577_p12)
}
  0x2c   : > { %484 = dma.hbm_to_vmem [thread:$0]  (!%p764_p0), %s758_s6, 128, %s760_s8, %s152_s10  }
  0x2d   : > { %p881_p1 = scmp.lt.s32.totalorder %s663_s17, 3  ;;  %p882_p2 = scmp.ge.s32.totalorder %s663_s17, 1 }
  0x2f   : > { %p168_p5 = pnand %p882_p2, %p881_p1 }
  0x30   : > { %s800_s5 = sand.u32 (!%p168_p5), 1, %s647_s13  }
  0x31   : > { %171 = sbr.rel (%p168_p5) target bundleno = 1008 (0x3f0), region = 32  ;;  %s452_s7 = sshll.u32 (!%p168_p5), %s800_s5, 3 }
  0x32   : > { %s174_s11 = scalar_lea.sflag (!%p168_p5), [#allocation3], %s800_s5  ;;  %s177_s9 = scalar_lea.vmem (!%p168_p5), [#allocation2], %s452_s7 }
  0x38   : > { %634 = dma.done.wait (%p736_p8), %s174_s11, 128  }
  0x39   : > { %636 = vsyncadd (%p736_p8), %s174_s11, 4294967168  ;;  %v201_v0 = vld [vmem:[%s177_s9] sm:$0xff]  ;;  %v666_v2 = vmov 0.0   ;;  %vm667_vm0 = vmmov 0   ;;  %vm261_vm1 = vcmask 64512   ;;  %vm272_vm2 = vcmask 1043456  }
  0x3a   : > { %v202_v1 = vmul.f32 %v201_v0, %v201_v0  ;;  %465 = vmatprep.subr.bf16.mxu0 %v666_v2  ;;  %471 = vmatprep.subr.bf16.mxu1 %v666_v2  ;;  %v268_v20 = vpack.c.bf16 %v201_v0, %v201_v0  ;;  %v455_v43 = vld [vmem:[%s872_s1] ss:$0 sm:$0xff]  ;;  %s458_s18 = sshll.u32 %s655_s15, 7  ;;  %s199_s19 = scalar_lea.vmem [#allocation5], %s452_s7 }
  0x3b   : > { %467 = vmatprep.mubr.msk.bf16.mxu0 %vm667_vm0, %v666_v2  ;;  %473 = vmatprep.mubr.msk.bf16.mxu1 %vm667_vm0, %v666_v2  ;;  %v456_v45 = vld [vmem:[%s873_s2] ss:$0 sm:$0xff]  ;;  %s364_s21 = sshll.u32 %s199_s19, 4  ;;  %s822_s28 = scalar_lea.hbm %s874_s3, %s458_s18  ;;  %s824_s21 = int_to_ptr.vmem [resolvable:$true] %s364_s21 }
  0x3c   : > { %203 = vadd.xlane.f32.xlu0 %v202_v1  ;;  %v274_v21 = vsel %vm272_vm2, %v268_v20, 0  ;;  %s350_s29 = scalar_lea.sflag [#allocation4], %s800_s5  ;;  %s581_s30 = scalar_lea.vmem %s824_s21, 128 }
  0x3d   : > { %472 = vmatpush3.bf16.msra.mxu1 %v274_v21  ;;  %p582_p8 = scmp.ne.s32.totalorder %s824_s21, %s581_s30  ;;  %p883_p9 = scmp.ne.s32.totalorder %s878_s25, 0 }
  0x3e   : > { %s668_s15 = smov [#allocation5]  }
  0x3f   : > { %p583_p11 = pnand %p582_p8, %p883_p9  ;;  %s585_s4 = sshll.u32 %s668_s15, 4  ;;  %s586_s4 = int_to_ptr.vmem [resolvable:$false] %s585_s4 }
  0x40   : > { %213 = vadd.xlane.f32.xlu0 %v202_v1  ;;  %s587_s7 = scalar_lea.vmem %s586_s4, 256  ;;  %p588_p7 = scmp.lt.s32.totalorder %s824_s21, %s586_s4 }
  0x41   : > { %p584_p0 = pneg %p583_p11  ;;  %p589_p13 = scmp.lt.s32.totalorder %s587_s7, %s581_s30 }
  0x43   : > { %p590_p3 = por %p589_p13, %p588_p7 }
  0x45   : > { %p591_p6 = pnand %p590_p3, %p584_p0 }
  0xc9   : > { %v204_v3 = vpop.xlane.xlu0 %203 }
  0xca   : > { %v205_v4 = vmax.f32 %v204_v3, 1e-24 }
  0xcc   : > { %541 = vrsqrt.f32 %v205_v4 }
  0xcd   : > { %v214_v5 = vpop.xlane.xlu0 %213 }
  0xce   : > { %v215_v6 = vmax.f32 %v214_v5, 1e-24 }
  0xd0   : > { %543 = vrsqrt.f32 %v215_v6 }
  0xd6   : > { %v542_v7 = vpop.eup %541 }
  0xd7   : > { %v207_v8 = vmul.f32 %v542_v7, %v201_v0 }
  0xd9   : > { %v208_v9 = vpack.c.bf16 %v207_v8, %v207_v8 }
  0xda   : > { %v544_v10 = vpop.eup %543 }
  0xdb   : > { %466 = vmatpush3.bf16.xpose.msra.mxu0 %v208_v9  ;;  %v217_v11 = vmul.f32 %v544_v10, %v201_v0 }
  0xdd   : > { %v218_v12 = vpack.c.bf16 %v217_v11, %v217_v11 }
  0xe2   : > { %468 = vmatmul.mubr.bf16.vlgmr.msra.gmra.mrb[0].mxu0 %v218_v12 }
 0x1b5   : > { %v253_v13 = vpop.f32.mrb[0].mxu0 }
 0x1b6   : > { %v259_v14 = vmul.f32 1.442695, %v253_v13  ;;  %v469_v15 = vpop.f32.mrb[1].mxu0 }
 0x1b7   : > { %v256_v16 = vpop.f32.mrb[2].mxu0 }
 0x1b8   : > { %545 = vpow2.f32 %v259_v14  ;;  %v470_v17 = vpop.f32.mrb[3].mxu0 }
 0x1c2   : > { %v546_v18 = vpop.eup %545 }
 0x1c3   : > { %v262_v19 = vsel %vm261_vm1, %v546_v18, 0.0 }
 0x1c4   : > { %263 = vadd.xlane.f32.xlu1 %v262_v19 }
 0x251   : > { %v264_v22 = vpop.xlane.xlu1 %263 }
 0x252   : > { %547 = vrcp.f32 %v264_v22 }
 0x25c   : > { %v548_v23 = vpop.eup %547 }
 0x25d   : > { %v266_v24 = vmul.f32 %v548_v23, %v546_v18 }
 0x25f   : > { %v267_v25 = vpack.c.bf16 %v266_v24, %v266_v24 }
 0x261   : > { %474 = vmatmul.mubr.msk.bf16.vlgmr.msra.gmra.mrb[0].mxu1 %vm261_vm1, %v267_v25 }
 0x334   : > { %v310_v26 = vpop.f32.mrb[0].mxu1 }
 0x335   : > { %v316_v27 = vmul.f32 0.1, %v310_v26  ;;  %v475_v28 = vpop.f32.mrb[1].mxu1 }
 0x336   : > { %v313_v29 = vpop.f32.mrb[2].mxu1 }
 0x337   : > { %v317_v30 = vsub.f32 %v201_v0, %v316_v27  ;;  %v476_v31 = vpop.f32.mrb[3].mxu1 }
 0x339   : > { %318 = vadd.xlane.f32.xlu1 %v317_v30  ;;  %v321_v32 = vmul.f32 %v317_v30, %v317_v30 }
 0x33b   : > { %322 = vadd.xlane.f32.xlu0 %v321_v32 }
 0x3c6   : > { %v319_v33 = vpop.xlane.xlu1 %318 }
 0x3c7   : > { %v320_v34 = vmul.f32 0.03125, %v319_v33 }
 0x3c8   : > { %v323_v35 = vpop.xlane.xlu0 %322 }
 0x3c9   : > { %v325_v36 = vmul.f32 %v320_v34, %v320_v34  ;;  %v324_v37 = vmul.f32 0.03125, %v323_v35  ;;  %v328_v41 = vsub.f32 %v317_v30, %v320_v34 }
 0x3cb   : > { %v326_v38 = vsub.f32 %v324_v37, %v325_v36 }
 0x3cd   : > { %v327_v39 = vmax.f32 %v326_v38, 0.0 }
 0x3cf   : > { %v329_v40 = vadd.f32 1e-06, %v327_v39 }
 0x3d1   : > { %549 = vrsqrt.f32 %v329_v40 }
 0x3db   : > { %v550_v42 = vpop.eup %549 }
 0x3dc   : > { %v331_v44 = vmul.f32 %v550_v42, %v328_v41 }
 0x3de   : > { %v339_v46 = vmul.f32 %v455_v43, %v331_v44 }
 0x3e0   : > { %v347_v47 = vadd.f32 %v456_v45, %v339_v46 }
 0x3e2   : > { %348 = vst [vmem:[%s199_s19] sm:$0xff] %v347_v47 }
 0x3e3   : > { %594 = shalt.err (!%p591_p6)
}
 0x3e4   : > { %s595_s5 = scalar_lea.hbm %s822_s28, 128  ;;  %s599_s24 = scalar_lea.hbm %s874_s3, 256 }
 0x3e5   : > { %p596_p4 = scmp.ne.s32.totalorder %s822_s28, %s595_s5  ;;  %p600_p1 = scmp.lt.u32.totalorder %s822_s28, %s874_s3 }
 0x3e6   : > { %p601_p2 = scmp.lt.u32.totalorder %s599_s24, %s595_s5  ;;  %p603_p8 = scmp.lt.u32.totalorder %s595_s5, %s822_s28 }
 0x3e7   : > { %p597_p10 = pnand %p596_p4, %p883_p9 }
 0x3e8   : > { %p602_p5 = por %p601_p2, %p600_p1 }
 0x3e9   : > { %p598_p12 = pneg %p597_p10 }
 0x3ea   : > { %p604_p11 = por %p603_p8, %p602_p5 }
 0x3ec   : > { %p605_p0 = pnand %p604_p11, %p598_p12 }
 0x3ee   : > { %608 = shalt.err (!%p605_p0)
}
 0x3ef   : > { %479 = dma.vmem_to_hbm [thread:$0]  (%p883_p9), %s824_s21, 128, %s822_s28, %s350_s29  }
 0x3f0 PF: > { %s376_s10 = sand.u32 1, %s643_s12   ;;  %p884_p7 = scmp.ne.s32.totalorder %s879_s27, 0 }
 0x3f1   : > { %p885_p13 = scmp.ge.s32.totalorder %s663_s17, 2  ;;  %s377_s18 = scalar_lea.sflag [#allocation4], %s376_s10 }
 0x3f3   : > { %p486_p3 = pnand %p885_p13, %p884_p7 }
 0x3f5   : > { %638 = dma.done.wait (!%p486_p3), %s377_s18, 128  }
 0x3f6   : > { %640 = vsyncadd (!%p486_p3), %s377_s18, 4294967168  ;;  %s19_s17 = sadd.s32 1, %s663_s17   ;;  %s886_s12 = smov %s647_s13 }
 0x3f7   : > { %p16_p6 = scmp.ge.s32.totalorder %s19_s17, 4   ;;  %s887_s13 = smov %s651_s14 }
 0x3f8   : > { %s888_s14 = smov %s745_s26  ;;  %s889_s15 = smov %s659_s16 }
 0x3f9   : > { %s890_s16 = smov %s892_s20  ;;  %18 = sbr.rel (!%p16_p6) target bundleno = 6 (0x6), region = 78 }
 0x400   :  { %382 = vsyncpa [#allocation3], 1 }
 0x401   :  { %384 = vsyncpa [#allocation3 + $0x1], 1 }
 0x402   :  { %385 = vsyncpa [#allocation4], 1 }
 0x403   :  { %387 = vsyncpa [#allocation4 + $0x1], 1 }

</bundles_post_ra>
